<compile_context>
chip_gen: v7x
topology: tpu7x:2x2x1
jax: 0.10.0
libtpu: 0.0.40
codegen_flags: <defaults>
</compile_context>

<pallas_src>
import functools

import jax
import jax.numpy as jnp
from jax import lax
from jax.experimental import pallas as pl
from jax.experimental.pallas import tpu as pltpu


def _round_up(x: int, m: int) -> int:
    return ((x + m - 1) // m) * m


def _pair_kl_kernel(inv_t_ref, q_ref, p_ref, s_ref, out_ref,
                    m_s_ref, l_s_ref, m_t_ref, l_t_ref, acc_ref,
                    *, batch: int, block_b: int):
    """One grid step over a (block_b, N) slab of query/positive pairs.

    Layouts:
      inv_t_ref : (1, 1) SMEM, 1 / temperature
      q_ref     : (block_b, N) VMEM, query embeddings (batch on sublanes)
      p_ref     : (block_b, N) VMEM, positive embeddings
      s_ref     : (block_b, 1) VMEM, teacher scores
      out_ref   : (1, 1) VMEM, KLDivLoss(reduction='batchmean')
      scratch   : five (1, 1) f32 VMEM accumulators
                  (running max / sum-exp for student & teacher, KL cross term)
    """
    i = pl.program_id(0)
    inv_t = inv_t_ref[0, 0]

    @pl.when(i == 0)
    def _init():
        m_s_ref[...] = jnp.full_like(m_s_ref, -jnp.inf)
        m_t_ref[...] = jnp.full_like(m_t_ref, -jnp.inf)
        l_s_ref[...] = jnp.zeros_like(l_s_ref)
        l_t_ref[...] = jnp.zeros_like(l_t_ref)
        acc_ref[...] = jnp.zeros_like(acc_ref)

    q = q_ref[...].astype(jnp.float32)            # (TB, N)
    p = p_ref[...].astype(jnp.float32)            # (TB, N)
    s = s_ref[...].astype(jnp.float32)            # (TB, 1)

    # Per-pair dot product <q_b, p_b>: VPU multiply + lane (XLU) reduce.
    # Deliberately NOT routed through the MXU (it is per-row, not a matmul).
    # TODO(synk): for very large N, chunk this reduce (fori_loop, unroll=True)
    # to avoid a full (TB, N) f32 temporary; tiles here are budget-capped so
    # it is not a problem at the default block size.
    sim = jnp.sum(q * p, axis=-1, keepdims=True) * inv_t      # (TB, 1)
    st = s * inv_t                                            # (TB, 1)

    # Mask rows beyond the true batch size (last, possibly partial tile).
    row = i * block_b + lax.broadcasted_iota(jnp.int32, (block_b, 1), 0)
    valid = row < batch
    neg_inf = jnp.float32(-jnp.inf)
    sim_m = jnp.where(valid, sim, neg_inf)
    st_m = jnp.where(valid, st, neg_inf)

    # Online log-sum-exp over the batch for the student logits (sim).
    m_s_old = m_s_ref[...]
    m_s_new = jnp.maximum(m_s_old, jnp.max(sim_m, axis=0, keepdims=True))
    l_s_ref[...] = (l_s_ref[...] * jnp.exp(m_s_old - m_s_new)
                    + jnp.sum(jnp.exp(sim_m - m_s_new), axis=0, keepdims=True))
    m_s_ref[...] = m_s_new

    # Online log-sum-exp over the batch for the teacher logits (scores / T),
    # plus the un-normalized KL cross term
    #   acc = sum_b exp(st_b - m_t) * (st_b - sim_b)
    # rescaled whenever the running max changes.  Underflowed weights give an
    # exact 0 contribution, matching nn.KLDivLoss's target==0 handling.
    m_t_old = m_t_ref[...]
    m_t_new = jnp.maximum(m_t_old, jnp.max(st_m, axis=0, keepdims=True))
    alpha_t = jnp.exp(m_t_old - m_t_new)
    w = jnp.exp(st_m - m_t_new)                               # 0 on masked rows
    l_t_ref[...] = l_t_ref[...] * alpha_t + jnp.sum(w, axis=0, keepdims=True)
    contrib = jnp.where(valid, w * (st - sim), jnp.float32(0.0))
    acc_ref[...] = acc_ref[...] * alpha_t + jnp.sum(contrib, axis=0, keepdims=True)
    m_t_ref[...] = m_t_new

    @pl.when(i == pl.num_programs(0) - 1)
    def _finish():
        lse_s = m_s_ref[...] + jnp.log(l_s_ref[...])
        lse_t = m_t_ref[...] + jnp.log(l_t_ref[...])
        # KL = sum_b t_b (log t_b - log p_b) = acc / l_t + lse_s - lse_t,
        # with t_b = exp(st_b - lse_t) and log p_b = sim_b - lse_s.
        kl = acc_ref[...] / l_t_ref[...] + lse_s - lse_t
        out_ref[...] = kl * jnp.float32(1.0 / batch)          # 'batchmean'


def pair_kl(query_embeddings, positive_embeddings, scores,
            temperature: float = 0.05,
            vmem_budget_bytes: int = 16 * 1024 * 1024):
    """Pallas-TPU implementation of PairKL.forward (KLDivLoss 'batchmean')."""
    B, N = query_embeddings.shape
    assert positive_embeddings.shape == (B, N)
    assert scores.shape == (B,)

    itemsize = jnp.dtype(query_embeddings.dtype).itemsize
    # Two streamed inputs x double buffer = 4 live tiles; keep them under a
    # budget that leaves headroom against v7x's smaller scoped VMEM while
    # still giving >= 512-row tiles at realistic N (near-roofline DMAs).
    tb = vmem_budget_bytes // (4 * N * itemsize)
    tb = max(8, min(_round_up(B, 8), (tb // 8) * 8))
    grid = (pl.cdiv(B, tb),)

    scores_col = scores.reshape(B, 1)                     # tiny; no big transposes
    inv_t = jnp.full((1, 1), 1.0 / float(temperature), dtype=jnp.float32)

    kernel = functools.partial(_pair_kl_kernel, batch=B, block_b=tb)

    out = pl.pallas_call(
        kernel,
        out_shape=jax.ShapeDtypeStruct((1, 1), jnp.float32),
        grid=grid,
        in_specs=[
            pl.BlockSpec(memory_space=pltpu.MemorySpace.SMEM),   # 1/T scalar
            pl.BlockSpec((tb, N), lambda i: (i, 0)),             # q  (B, N)
            pl.BlockSpec((tb, N), lambda i: (i, 0)),             # p  (B, N)
            pl.BlockSpec((tb, 1), lambda i: (i, 0)),             # scores (B, 1)
        ],
        out_specs=pl.BlockSpec((1, 1), lambda i: (0, 0)),        # scalar loss
        scratch_shapes=[pltpu.VMEM((1, 1), jnp.float32)] * 5,
        compiler_params=pltpu.CompilerParams(
            dimension_semantics=("arbitrary",)),                 # online reduction axis
        cost_estimate=pl.CostEstimate(
            flops=2 * B * N + 12 * B,
            transcendentals=2 * B + 8,
            bytes_accessed=2 * B * N * itemsize + B * 4 + 8),
    )(inv_t, query_embeddings, positive_embeddings, scores_col)
    return out[0, 0]


def _pair_kl_reference(q, p, scores, temperature=0.05):
    sim = jnp.sum(q.astype(jnp.float32) * p.astype(jnp.float32), axis=-1) / temperature
    log_probs = jax.nn.log_softmax(sim, axis=-1)
    target = jax.nn.softmax(scores.astype(jnp.float32) / temperature, axis=-1)
    kl = jnp.where(target > 0, target * (jnp.log(target) - log_probs), 0.0)
    return jnp.sum(kl) / q.shape[0]


if __name__ == "__main__":
    key = jax.random.PRNGKey(0)
    k_q, k_p, k_s = jax.random.split(key, 3)

    B, N = 8, 32  # batch of query/positive pairs, embedding dim
    q = jax.random.normal(k_q, (B, N), dtype=jnp.float32)
    q = q / jnp.linalg.norm(q, axis=-1, keepdims=True)
    p = jax.random.normal(k_p, (B, N), dtype=jnp.float32)
    p = p / jnp.linalg.norm(p, axis=-1, keepdims=True)
    scores = jax.random.uniform(k_s, (B,), dtype=jnp.float32)

    loss = pair_kl(q, p, scores, temperature=0.05)
    jax.block_until_ready(loss)

    ref = _pair_kl_reference(q, p, scores, temperature=0.05)
    assert jnp.allclose(loss, ref, atol=1e-5, rtol=1e-5), (loss, ref)

    print("KERNEL_OK")
</pallas_src>

<mosaic_0001>
module attributes {stable_mosaic.version = 11 : i64} {
  func.func @_pair_kl_kernel(%arg0: i32, %arg1: memref<1x1xf32, #tpu.memory_space<smem>>, %arg2: memref<8x32xf32, #tpu.memory_space<vmem>>, %arg3: memref<8x32xf32, #tpu.memory_space<vmem>>, %arg4: memref<8x1xf32, #tpu.memory_space<vmem>>, %arg5: memref<1x1xf32, #tpu.memory_space<vmem>>, %arg6: memref<1x1xf32, #tpu.memory_space<vmem>>, %arg7: memref<1x1xf32, #tpu.memory_space<vmem>>, %arg8: memref<1x1xf32, #tpu.memory_space<vmem>>, %arg9: memref<1x1xf32, #tpu.memory_space<vmem>>, %arg10: memref<1x1xf32, #tpu.memory_space<vmem>>) attributes {dimension_semantics = [#tpu.dimension_semantics<arbitrary>], iteration_bounds = array<i64: 1>, scalar_prefetch = 0 : i64, scratch_operands = 5 : i64, tpu.core_type = #tpu.core_type<tc>, window_params = [{transform_indices = @transform_0, window_bounds = array<i64: 1, 1>}, {transform_indices = @transform_1, window_bounds = array<i64: 8, 32>}, {transform_indices = @transform_2, window_bounds = array<i64: 8, 32>}, {transform_indices = @transform_3, window_bounds = array<i64: 8, 1>}, {pipeline_mode = #tpu.pipeline_mode<synchronous>, transform_indices = @transform_4, window_bounds = array<i64: 1, 1>}]} {
    %c0 = arith.constant 0 : index
    %c0_0 = arith.constant 0 : index
    %0 = memref.load %arg1[%c0, %c0_0] : memref<1x1xf32, #tpu.memory_space<smem>>
    %c0_i32 = arith.constant 0 : i32
    %1 = arith.cmpi eq, %arg0, %c0_i32 : i32
    %2 = arith.extui %1 : i1 to i32
    %c0_i32_1 = arith.constant 0 : i32
    %3 = arith.cmpi ne, %2, %c0_i32_1 : i32
    scf.if %3 {
      %cst_39 = arith.constant 0xFF800000 : f32
      %69 = vector.broadcast %cst_39 : f32 to vector<1x1xf32>
      %c0_40 = arith.constant 0 : index
      %c0_41 = arith.constant 0 : index
      %70 = vector.load %arg6[%c0_40, %c0_41] : memref<1x1xf32, #tpu.memory_space<vmem>>, vector<1x1xf32>
      tpu.vector_store %arg6[%c0_40, %c0_41], %69 {strides = array<i32>} : memref<1x1xf32, #tpu.memory_space<vmem>>, vector<1x1xf32>,
      %cst_42 = arith.constant 0xFF800000 : f32
      %71 = vector.broadcast %cst_42 : f32 to vector<1x1xf32>
      %c0_43 = arith.constant 0 : index
      %c0_44 = arith.constant 0 : index
      %72 = vector.load %arg8[%c0_43, %c0_44] : memref<1x1xf32, #tpu.memory_space<vmem>>, vector<1x1xf32>
      tpu.vector_store %arg8[%c0_43, %c0_44], %71 {strides = array<i32>} : memref<1x1xf32, #tpu.memory_space<vmem>>, vector<1x1xf32>,
      %cst_45 = arith.constant 0.000000e+00 : f32
      %73 = vector.broadcast %cst_45 : f32 to vector<1x1xf32>
      %c0_46 = arith.constant 0 : index
      %c0_47 = arith.constant 0 : index
      %74 = vector.load %arg7[%c0_46, %c0_47] : memref<1x1xf32, #tpu.memory_space<vmem>>, vector<1x1xf32>
      tpu.vector_store %arg7[%c0_46, %c0_47], %73 {strides = array<i32>} : memref<1x1xf32, #tpu.memory_space<vmem>>, vector<1x1xf32>,
      %cst_48 = arith.constant 0.000000e+00 : f32
      %75 = vector.broadcast %cst_48 : f32 to vector<1x1xf32>
      %c0_49 = arith.constant 0 : index
      %c0_50 = arith.constant 0 : index
      %76 = vector.load %arg9[%c0_49, %c0_50] : memref<1x1xf32, #tpu.memory_space<vmem>>, vector<1x1xf32>
      tpu.vector_store %arg9[%c0_49, %c0_50], %75 {strides = array<i32>} : memref<1x1xf32, #tpu.memory_space<vmem>>, vector<1x1xf32>,
      %cst_51 = arith.constant 0.000000e+00 : f32
      %77 = vector.broadcast %cst_51 : f32 to vector<1x1xf32>
      %c0_52 = arith.constant 0 : index
      %c0_53 = arith.constant 0 : index
      %78 = vector.load %arg10[%c0_52, %c0_53] : memref<1x1xf32, #tpu.memory_space<vmem>>, vector<1x1xf32>
      tpu.vector_store %arg10[%c0_52, %c0_53], %77 {strides = array<i32>} : memref<1x1xf32, #tpu.memory_space<vmem>>, vector<1x1xf32>,
    } else {
    }
    %c0_2 = arith.constant 0 : index
    %c0_3 = arith.constant 0 : index
    %4 = vector.load %arg2[%c0_2, %c0_3] : memref<8x32xf32, #tpu.memory_space<vmem>>, vector<8x32xf32>
    %c0_4 = arith.constant 0 : index
    %c0_5 = arith.constant 0 : index
    %5 = vector.load %arg3[%c0_4, %c0_5] : memref<8x32xf32, #tpu.memory_space<vmem>>, vector<8x32xf32>
    %c0_6 = arith.constant 0 : index
    %c0_7 = arith.constant 0 : index
    %6 = vector.load %arg4[%c0_6, %c0_7] : memref<8x1xf32, #tpu.memory_space<vmem>>, vector<8x1xf32>
    %7 = arith.mulf %4, %5 : vector<8x32xf32>
    %cst = arith.constant dense<0.000000e+00> : vector<8xf32>
    %8 = vector.multi_reduction <add>, %7, %cst [1] : vector<8x32xf32> to vector<8xf32>
    %9 = vector.shape_cast %8 : vector<8xf32> to vector<8x1xf32>
    %10 = vector.broadcast %0 : f32 to vector<8x1xf32>
    %11 = arith.mulf %9, %10 : vector<8x1xf32>
    %12 = vector.broadcast %0 : f32 to vector<8x1xf32>
    %13 = arith.mulf %6, %12 : vector<8x1xf32>
    %c8_i32 = arith.constant 8 : i32
    %14 = arith.muli %arg0, %c8_i32 : i32
    %15 = tpu.iota {dimensions = array<i32: 0>} : vector<8x1xi32>
    %16 = vector.broadcast %14 : i32 to vector<8x1xi32>
    %17 = arith.addi %16, %15 : vector<8x1xi32>
    %c8_i32_8 = arith.constant 8 : i32
    %18 = vector.broadcast %c8_i32_8 : i32 to vector<8x1xi32>
    %19 = arith.cmpi slt, %17, %18 : vector<8x1xi32>
    %cst_9 = arith.constant 0xFF800000 : f32
    %20 = vector.broadcast %cst_9 : f32 to vector<8x1xf32>
    %21 = arith.select %19, %11, %20 : vector<8x1xi1>, vector<8x1xf32>
    %cst_10 = arith.constant 0xFF800000 : f32
    %22 = vector.broadcast %cst_10 : f32 to vector<8x1xf32>
    %23 = arith.select %19, %13, %22 : vector<8x1xi1>, vector<8x1xf32>
    %c0_11 = arith.constant 0 : index
    %c0_12 = arith.constant 0 : index
    %24 = vector.load %arg6[%c0_11, %c0_12] : memref<1x1xf32, #tpu.memory_space<vmem>>, vector<1x1xf32>
    %cst_13 = arith.constant dense<0xFF800000> : vector<1xf32>
    %25 = vector.multi_reduction <maximumf>, %21, %cst_13 [0] : vector<8x1xf32> to vector<1xf32>
    %26 = vector.shape_cast %25 : vector<1xf32> to vector<1x1xf32>
    %27 = arith.maximumf %24, %26 : vector<1x1xf32>
    %c0_14 = arith.constant 0 : index
    %c0_15 = arith.constant 0 : index
    %28 = vector.load %arg7[%c0_14, %c0_15] : memref<1x1xf32, #tpu.memory_space<vmem>>, vector<1x1xf32>
    %29 = arith.subf %24, %27 : vector<1x1xf32>
    %30 = math.exp %29 : vector<1x1xf32>
    %31 = arith.mulf %28, %30 : vector<1x1xf32>
    %32 = vector.broadcast %27 : vector<1x1xf32> to vector<8x1xf32>
    %33 = arith.subf %21, %32 : vector<8x1xf32>
    %34 = math.exp %33 : vector<8x1xf32>
    %cst_16 = arith.constant dense<0.000000e+00> : vector<1xf32>
    %35 = vector.multi_reduction <add>, %34, %cst_16 [0] : vector<8x1xf32> to vector<1xf32>
    %36 = vector.shape_cast %35 : vector<1xf32> to vector<1x1xf32>
    %37 = arith.addf %31, %36 : vector<1x1xf32>
    %c0_17 = arith.constant 0 : index
    %c0_18 = arith.constant 0 : index
    %38 = vector.load %arg7[%c0_17, %c0_18] : memref<1x1xf32, #tpu.memory_space<vmem>>, vector<1x1xf32>
    tpu.vector_store %arg7[%c0_17, %c0_18], %37 {strides = array<i32>} : memref<1x1xf32, #tpu.memory_space<vmem>>, vector<1x1xf32>,
    %c0_19 = arith.constant 0 : index
    %c0_20 = arith.constant 0 : index
    %39 = vector.load %arg6[%c0_19, %c0_20] : memref<1x1xf32, #tpu.memory_space<vmem>>, vector<1x1xf32>
    tpu.vector_store %arg6[%c0_19, %c0_20], %27 {strides = array<i32>} : memref<1x1xf32, #tpu.memory_space<vmem>>, vector<1x1xf32>,
    %c0_21 = arith.constant 0 : index
    %c0_22 = arith.constant 0 : index
    %40 = vector.load %arg8[%c0_21, %c0_22] : memref<1x1xf32, #tpu.memory_space<vmem>>, vector<1x1xf32>
    %cst_23 = arith.constant dense<0xFF800000> : vector<1xf32>
    %41 = vector.multi_reduction <maximumf>, %23, %cst_23 [0] : vector<8x1xf32> to vector<1xf32>
    %42 = vector.shape_cast %41 : vector<1xf32> to vector<1x1xf32>
    %43 = arith.maximumf %40, %42 : vector<1x1xf32>
    %44 = arith.subf %40, %43 : vector<1x1xf32>
    %45 = math.exp %44 : vector<1x1xf32>
    %46 = vector.broadcast %43 : vector<1x1xf32> to vector<8x1xf32>
    %47 = arith.subf %23, %46 : vector<8x1xf32>
    %48 = math.exp %47 : vector<8x1xf32>
    %c0_24 = arith.constant 0 : index
    %c0_25 = arith.constant 0 : index
    %49 = vector.load %arg9[%c0_24, %c0_25] : memref<1x1xf32, #tpu.memory_space<vmem>>, vector<1x1xf32>
    %50 = arith.mulf %49, %45 : vector<1x1xf32>
    %cst_26 = arith.constant dense<0.000000e+00> : vector<1xf32>
    %51 = vector.multi_reduction <add>, %48, %cst_26 [0] : vector<8x1xf32> to vector<1xf32>
    %52 = vector.shape_cast %51 : vector<1xf32> to vector<1x1xf32>
    %53 = arith.addf %50, %52 : vector<1x1xf32>
    %c0_27 = arith.constant 0 : index
    %c0_28 = arith.constant 0 : index
    %54 = vector.load %arg9[%c0_27, %c0_28] : memref<1x1xf32, #tpu.memory_space<vmem>>, vector<1x1xf32>
    tpu.vector_store %arg9[%c0_27, %c0_28], %53 {strides = array<i32>} : memref<1x1xf32, #tpu.memory_space<vmem>>, vector<1x1xf32>,
    %55 = arith.subf %13, %11 : vector<8x1xf32>
    %56 = arith.mulf %48, %55 : vector<8x1xf32>
    %cst_29 = arith.constant 0.000000e+00 : f32
    %57 = vector.broadcast %cst_29 : f32 to vector<8x1xf32>
    %58 = arith.select %19, %56, %57 : vector<8x1xi1>, vector<8x1xf32>
    %c0_30 = arith.constant 0 : index
    %c0_31 = arith.constant 0 : index
    %59 = vector.load %arg10[%c0_30, %c0_31] : memref<1x1xf32, #tpu.memory_space<vmem>>, vector<1x1xf32>
    %60 = arith.mulf %59, %45 : vector<1x1xf32>
    %cst_32 = arith.constant dense<0.000000e+00> : vector<1xf32>
    %61 = vector.multi_reduction <add>, %58, %cst_32 [0] : vector<8x1xf32> to vector<1xf32>
    %62 = vector.shape_cast %61 : vector<1xf32> to vector<1x1xf32>
    %63 = arith.addf %60, %62 : vector<1x1xf32>
    %c0_33 = arith.constant 0 : index
    %c0_34 = arith.constant 0 : index
    %64 = vector.load %arg10[%c0_33, %c0_34] : memref<1x1xf32, #tpu.memory_space<vmem>>, vector<1x1xf32>
    tpu.vector_store %arg10[%c0_33, %c0_34], %63 {strides = array<i32>} : memref<1x1xf32, #tpu.memory_space<vmem>>, vector<1x1xf32>,
    %c0_35 = arith.constant 0 : index
    %c0_36 = arith.constant 0 : index
    %65 = vector.load %arg8[%c0_35, %c0_36] : memref<1x1xf32, #tpu.memory_space<vmem>>, vector<1x1xf32>
    tpu.vector_store %arg8[%c0_35, %c0_36], %43 {strides = array<i32>} : memref<1x1xf32, #tpu.memory_space<vmem>>, vector<1x1xf32>,
    %c0_i32_37 = arith.constant 0 : i32
    %66 = arith.cmpi eq, %arg0, %c0_i32_37 : i32
    %67 = arith.extui %66 : i1 to i32
    %c0_i32_38 = arith.constant 0 : i32
    %68 = arith.cmpi ne, %67, %c0_i32_38 : i32
    scf.if %68 {
      %c0_39 = arith.constant 0 : index
      %c0_40 = arith.constant 0 : index
      %69 = vector.load %arg6[%c0_39, %c0_40] : memref<1x1xf32, #tpu.memory_space<vmem>>, vector<1x1xf32>
      %c0_41 = arith.constant 0 : index
      %c0_42 = arith.constant 0 : index
      %70 = vector.load %arg7[%c0_41, %c0_42] : memref<1x1xf32, #tpu.memory_space<vmem>>, vector<1x1xf32>
      %71 = math.log %70 : vector<1x1xf32>
      %72 = arith.addf %69, %71 : vector<1x1xf32>
      %c0_43 = arith.constant 0 : index
      %c0_44 = arith.constant 0 : index
      %73 = vector.load %arg8[%c0_43, %c0_44] : memref<1x1xf32, #tpu.memory_space<vmem>>, vector<1x1xf32>
      %c0_45 = arith.constant 0 : index
      %c0_46 = arith.constant 0 : index
      %74 = vector.load %arg9[%c0_45, %c0_46] : memref<1x1xf32, #tpu.memory_space<vmem>>, vector<1x1xf32>
      %75 = math.log %74 : vector<1x1xf32>
      %76 = arith.addf %73, %75 : vector<1x1xf32>
      %c0_47 = arith.constant 0 : index
      %c0_48 = arith.constant 0 : index
      %77 = vector.load %arg10[%c0_47, %c0_48] : memref<1x1xf32, #tpu.memory_space<vmem>>, vector<1x1xf32>
      %c0_49 = arith.constant 0 : index
      %c0_50 = arith.constant 0 : index
      %78 = vector.load %arg9[%c0_49, %c0_50] : memref<1x1xf32, #tpu.memory_space<vmem>>, vector<1x1xf32>
      %79 = arith.divf %77, %78 : vector<1x1xf32>
      %80 = arith.addf %79, %72 : vector<1x1xf32>
      %81 = arith.subf %80, %76 : vector<1x1xf32>
      %cst_51 = arith.constant 1.250000e-01 : f32
      %82 = vector.broadcast %cst_51 : f32 to vector<1x1xf32>
      %83 = arith.mulf %81, %82 : vector<1x1xf32>
      %c0_52 = arith.constant 0 : index
      %c0_53 = arith.constant 0 : index
      %84 = vector.load %arg5[%c0_52, %c0_53] : memref<1x1xf32, #tpu.memory_space<vmem>>, vector<1x1xf32>
      tpu.vector_store %arg5[%c0_52, %c0_53], %83 {strides = array<i32>} : memref<1x1xf32, #tpu.memory_space<vmem>>, vector<1x1xf32>,
    } else {
    }
    return
  }
  func.func @transform_0(%arg0: i32) -> (i32, i32) {
    %c0_i32 = arith.constant 0 : i32
    %c0_i32_0 = arith.constant 0 : i32
    %c0_i32_1 = arith.constant 0 : i32
    return %c0_i32, %c0_i32_0 : i32, i32
  }
  func.func @transform_1(%arg0: i32) -> (i32, i32) {
    %c0_i32 = arith.constant 0 : i32
    %c0_i32_0 = arith.constant 0 : i32
    return %arg0, %c0_i32 : i32, i32
  }
  func.func @transform_2(%arg0: i32) -> (i32, i32) {
    %c0_i32 = arith.constant 0 : i32
    %c0_i32_0 = arith.constant 0 : i32
    return %arg0, %c0_i32 : i32, i32
  }
  func.func @transform_3(%arg0: i32) -> (i32, i32) {
    %c0_i32 = arith.constant 0 : i32
    %c0_i32_0 = arith.constant 0 : i32
    return %arg0, %c0_i32 : i32, i32
  }
  func.func @transform_4(%arg0: i32) -> (i32, i32) {
    %c0_i32 = arith.constant 0 : i32
    %c0_i32_0 = arith.constant 0 : i32
    %c0_i32_1 = arith.constant 0 : i32
    return %c0_i32, %c0_i32_0 : i32, i32
  }
}

</mosaic_0001>

<bundles_post_ra>
// kernel: tpu_custom_call.1
= control target key start
LH: loop header
LB: loop body
LE: loop exit
PB: predicated region body
PF: predicated region fallthrough
CT: control target
= control target key end

     0   :  { %vm34_vm0 = vcmask 261120   ;;  %vm24_vm1 = vcmask 0   ;;  %v205_v3 = vmov -inf   ;;  %v206_v4 = vmov 0.0   ;;  %s272_s0 = inlined_call_operand.<no memory space> [shape: f32[1,1], index: 0, kind: input, shape index: {}]   ;;  %s273_s1 = inlined_call_operand.vmem [shape: f32[8,32], index: 1, kind: input, shape index: {}]   ;;  %s274_s2 = inlined_call_operand.vmem [shape: f32[8,32], index: 2, kind: input, shape index: {}]   ;;  %s275_s3 = inlined_call_operand.vmem [shape: f32[8,1], index: 3, kind: input, shape index: {}]   ;;  %s276_s4 = inlined_call_operand.hbm [shape: f32[1,1], index: 4, kind: output, shape index: {}]  }
   0x1   :  { %v30_v0 = vld [vmem:[%s273_s1] sm:$0xff]  ;;  %25 = vst.msk [vmem:[#allocation2] sm:$0x1] %vm24_vm1, %v205_v3  ;;  %26 = vst.msk [vmem:[#allocation4] sm:$0x1] %vm24_vm1, %v205_v3  ;;  %v38_v6 = vstv %s272_s0  ;;  %vm71_vm2 = vcmask 7168  }
   0x2   :  { %v31_v1 = vld [vmem:[%s274_s2] sm:$0xff]  ;;  %27 = vst.msk [vmem:[#allocation3] sm:$0x1] %vm24_vm1, %v206_v4  ;;  %28 = vst.msk [vmem:[#allocation5] sm:$0x1] %vm24_vm1, %v206_v4 }
   0x3   :  { %v33_v2 = vmul.f32 %v31_v1, %v30_v0  ;;  %29 = vst.msk [vmem:[#allocation6] sm:$0x1] %vm24_vm1, %v206_v4  ;;  %v32_v5 = vld [vmem:[%s275_s3] sm:$0xff] }
   0x4   :  { %10 = vsyncpa [#allocation9], 0  ;;  %v40_v7 = vmul.f32 %v38_v6, %v32_v5  ;;  %v63_v11 = vlaneseq  ;;  %s207_s0 = smov [#allocation8]  }
   0x5   :  { %v35_v8 = vsel %vm34_vm0, %v33_v2, 0.0  ;;  %s156_s3 = sshll.u32 %s207_s0, 4  ;;  %s157_s3 = int_to_ptr.vmem [resolvable:$true] %s156_s3 }
   0x6   :  { %36 = vadd.xlane.f32.xlu0 %v35_v8  ;;  %v84_v9 = vsel %vm71_vm2, %v40_v7, -inf  ;;  %v64_v14 = vshrl.u32 %v63_v11, 7  ;;  %s181_s21 = scalar_lea.vmem %s157_s3, 16  ;;  %s185_s22 = scalar_lea.vmem %s157_s3, 32 }
   0x7   :  { %v85_v10 = vrot.slane %v84_v9, 4  ;;  %p182_p0 = scmp.ne.s32.totalorder %s157_s3, %s181_s21  ;;  %p186_p1 = scmp.lt.s32.totalorder %s157_s3, %s157_s3 }
   0x8   :  { %v83_v17 = vld [vmem:[#allocation4] sm:$0x1]  ;;  %v65_v18 = vsub.s32 0, %v64_v14  ;;  %v49_v50 = vld [vmem:[#allocation2] sm:$0x1]  ;;  %p187_p2 = scmp.lt.s32.totalorder %s185_s22, %s181_s21 }
   0x9   :  { %v86_v12 = vmax.f32 %v84_v9, %v85_v10  ;;  %v104_v32 = vld [vmem:[#allocation5] sm:$0x1]  ;;  %v57_v8 = vld [vmem:[#allocation3] sm:$0x1] }
   0xa   :  { %v118_v53 = vld [vmem:[#allocation6] sm:$0x1]  ;;  %p188_p3 = por %p187_p2, %p186_p1 }
   0xb   :  { %v87_v13 = vrot.slane %v86_v12, 2 }
   0xc   :  { %p189_p4 = pnand %p188_p3, %p182_p0 }
   0xd   :  { %v88_v15 = vmax.f32 %v86_v12, %v87_v13 }
   0xf   :  { %v89_v16 = vrot.slane %v88_v15, 1 }
  0x11   :  { %v90_v19 = vmax.f32 %v88_v15, %v89_v16 }
  0x13   :  { %v91_v20 = vmax.f32 %v83_v17, %v90_v19 }
  0x15   :  { %v99_v21 = vrot.slane %v91_v20, %v65_v18  ;;  %129 = vst.msk [vmem:[#allocation4] sm:$0x1] %vm24_vm1, %v91_v20  ;;  %v92_v24 = vsub.f32 %v83_v17, %v91_v20 }
  0x17   :  { %v101_v22 = vsub.f32 %v40_v7, %v99_v21  ;;  %v93_v25 = vmul.f32 1.442695, %v92_v24 }
  0x19   :  { %v102_v23 = vmul.f32 1.442695, %v101_v22 }
  0x1b   :  { %167 = vpow2.f32 %v102_v23 }
  0x1c   :  { %169 = vpow2.f32 %v93_v25  ;;  %v138_v19 = vld [vmem:[#allocation4] sm:$0x1] }
  0x25   :  { %v168_v26 = vpop.eup %167 }
  0x26   :  { %v106_v27 = vsel %vm71_vm2, %v168_v26, 0.0  ;;  %v170_v31 = vpop.eup %169 }
  0x27   :  { %v107_v28 = vrot.slane %v106_v27, 4  ;;  %v105_v34 = vmul.f32 %v170_v31, %v104_v32  ;;  %v119_v56 = vmul.f32 %v170_v31, %v118_v53 }
  0x29   :  { %v108_v29 = vadd.f32 %v107_v28, %v106_v27 }
  0x2b   :  { %v109_v30 = vrot.slane %v108_v29, 2 }
  0x2d   :  { %v110_v33 = vadd.f32 %v109_v30, %v108_v29 }
  0x2f   :  { %v111_v35 = vrot.slane %v110_v33, 1 }
  0x31   :  { %v112_v36 = vadd.f32 %v111_v35, %v110_v33 }
  0x33   :  { %v113_v37 = vadd.f32 %v112_v36, %v105_v34 }
  0x35   :  { %114 = vst.msk [vmem:[#allocation5] sm:$0x1] %vm24_vm1, %v113_v37 }
  0x3c   :  { %v139_v13 = vld [vmem:[#allocation5] sm:$0x1] }
  0x93   :  { %v37_v38 = vpop.xlane.xlu0 %36 }
  0x94   :  { %v39_v39 = vmul.f32 %v38_v6, %v37_v38 }
  0x96   :  { %v50_v40 = vrot.slane %v39_v39, 4  ;;  %v115_v41 = vsub.f32 %v40_v7, %v39_v39 }
  0x98   :  { %v51_v42 = vmax.f32 %v39_v39, %v50_v40  ;;  %v116_v43 = vmul.f32 %v168_v26, %v115_v41 }
  0x9a   :  { %v52_v44 = vrot.slane %v51_v42, 2  ;;  %v120_v45 = vsel %vm71_vm2, %v116_v43, 0.0 }
  0x9b   :  { %v121_v46 = vrot.slane %v120_v45, 4 }
  0x9c   :  { %v53_v47 = vmax.f32 %v51_v42, %v52_v44 }
  0x9d   :  { %v122_v48 = vadd.f32 %v121_v46, %v120_v45 }
  0x9e   :  { %v54_v49 = vrot.slane %v53_v47, 1 }
  0x9f   :  { %v123_v51 = vrot.slane %v122_v48, 2 }
  0xa0   :  { %v55_v52 = vmax.f32 %v53_v47, %v54_v49 }
  0xa1   :  { %v124_v54 = vadd.f32 %v123_v51, %v122_v48 }
  0xa2   :  { %v56_v55 = vmax.f32 %v49_v50, %v55_v52 }
  0xa3   :  { %v125_v57 = vrot.slane %v124_v54, 1 }
  0xa4   :  { %v66_v58 = vrot.slane %v56_v55, %v65_v18  ;;  %82 = vst.msk [vmem:[#allocation2] sm:$0x1] %vm24_vm1, %v56_v55  ;;  %v58_v63 = vsub.f32 %v49_v50, %v56_v55 }
  0xa5   :  { %v126_v59 = vadd.f32 %v125_v57, %v124_v54 }
  0xa6   :  { %v68_v60 = vsub.f32 %v39_v39, %v66_v58  ;;  %v59_v0 = vmul.f32 1.442695, %v58_v63 }
  0xa7   :  { %v127_v61 = vadd.f32 %v126_v59, %v119_v56 }
  0xa8   :  { %v69_v62 = vmul.f32 1.442695, %v68_v60 }
  0xa9   :  { %128 = vst.msk [vmem:[#allocation6] sm:$0x1] %vm24_vm1, %v127_v61 }
  0xaa   :  { %171 = vpow2.f32 %v69_v62 }
  0xab   :  { %173 = vpow2.f32 %v59_v0  ;;  %v133_v22 = vld [vmem:[#allocation2] sm:$0x1] }
  0xac   :  { %175 = vlog2.f32 %v139_v13 }
  0xad   :  { %177 = vrcp.f32 %v139_v13 }
  0xb0   :  { %v143_v20 = vld [vmem:[#allocation6] sm:$0x1] }
  0xb4   :  { %v172_v1 = vpop.eup %171 }
  0xb5   :  { %v72_v2 = vsel %vm71_vm2, %v172_v1, 0.0  ;;  %v174_v7 = vpop.eup %173 }
  0xb6   :  { %v73_v3 = vrot.slane %v72_v2, 4  ;;  %v61_v10 = vmul.f32 %v174_v7, %v57_v8  ;;  %v176_v15 = vpop.eup %175 }
  0xb7   :  { %v178_v16 = vpop.eup %177  ;;  %v141_v17 = vmul.f32 0.6931472, %v176_v15 }
  0xb8   :  { %v74_v4 = vadd.f32 %v73_v3, %v72_v2  ;;  %v145_v25 = vmul.f32 %v178_v16, %v143_v20 }
  0xb9   :  { %v142_v24 = vadd.f32 %v141_v17, %v138_v19 }
  0xba   :  { %v75_v5 = vrot.slane %v74_v4, 2 }
  0xbc   :  { %v76_v6 = vadd.f32 %v75_v5, %v74_v4 }
  0xbe   :  { %v77_v9 = vrot.slane %v76_v6, 1 }
  0xc0   :  { %v78_v11 = vadd.f32 %v77_v9, %v76_v6 }
  0xc2   :  { %v79_v12 = vadd.f32 %v78_v11, %v61_v10 }
  0xc4   :  { %81 = vst.msk [vmem:[#allocation3] sm:$0x1] %vm24_vm1, %v79_v12 }
  0xcb   :  { %v134_v14 = vld [vmem:[#allocation3] sm:$0x1] }
  0xcc   :  { %179 = vlog2.f32 %v134_v14 }
  0xd6   :  { %v180_v18 = vpop.eup %179 }
  0xd7   :  { %v136_v21 = vmul.f32 0.6931472, %v180_v18 }
  0xd9   :  { %v137_v23 = vadd.f32 %v136_v21, %v133_v22 }
  0xdb   :  { %v146_v26 = vadd.f32 %v145_v25, %v137_v23 }
  0xdd   :  { %v147_v27 = vsub.f32 %v146_v26, %v142_v24 }
  0xdf   :  { %v148_v28 = vmul.f32 0.125, %v147_v27 }
  0xe1   :  { %149 = vst.msk [vmem:[#allocation8] sm:$0x1] %vm24_vm1, %v148_v28 }
  0xe2   :  { %192 = shalt.err (!%p189_p4)
}
  0xe3   :  { %s193_s25 = scalar_lea.hbm %s276_s4, 16 }
  0xe4   :  { %p194_p5 = scmp.ne.s32.totalorder %s276_s4, %s193_s25  ;;  %p197_p6 = scmp.lt.u32.totalorder %s193_s25, %s276_s4 }
  0xe6   :  { %p199_p7 = pnand %p197_p6, %p194_p5 }
  0xe8   :  { %202 = shalt.err (!%p199_p7)
}
  0xe9   :  { %159 = dma.vmem_to_hbm [thread:$0]  %s157_s3, 16, %s276_s4, [#allocation9]  }
  0xea   :  { %203 = dma.done.wait [#allocation9], 16  }
  0xeb   :  { %204 = vsyncadd [#allocation9], 4294967280 }
  0xec   :  { %163 = vsyncpa [#allocation9], 1 }

</bundles_post_ra>
